<compile_context>
chip_gen: v6e
topology: v6e:2x2x1
jax: 0.10.0
libtpu: 0.0.40
codegen_flags: <defaults>
</compile_context>

<pallas_src>
import functools

import jax
import jax.numpy as jnp
from jax.experimental import pallas as pl
from jax.experimental.pallas import tpu as pltpu

LATENT_DIM = 256
INPUT_DIM = 42
HIDDEN = [64, 128, 256, 512]

# Lane-padded widths used inside the kernel (multiples of 128).
H1_PAD = 128    # hidden[0]: 64 -> 128
OUT_PAD = 128   # output:    42 -> 128


# ----------------------------------------------------------------------------
# Kernel
# ----------------------------------------------------------------------------
def decoder_kernel(x_ref,
                   w1_ref, b1_ref,
                   w2_ref, b2_ref,
                   w3_ref, b3_ref,
                   w4_ref, b4_ref,
                   w5_ref, b5_ref,
                   out_ref, *, bf16_epilogue):
    """Whole decoder MLP on one batch tile: 5 bf16 MXU matmuls, f32 accum.

    bf16_epilogue=True (v6e/v7x): bias + ReLU + downcast run in bf16 (packed
    2-per-lane VPU, half the VMEM temps). False (v5e: no bf16 VPU): f32 path.
    """

    def hidden_layer(h_bf16, w_ref, b_ref):
        acc = jnp.dot(h_bf16, w_ref[...], preferred_element_type=jnp.float32)
        if bf16_epilogue:
            h = acc.astype(jnp.bfloat16) + b_ref[...].astype(jnp.bfloat16)
            return jnp.maximum(h, 0.0)                      # stays bf16
        h = jnp.maximum(acc + b_ref[...], 0.0)              # f32 epilogue
        return h.astype(jnp.bfloat16)

    h = x_ref[...].astype(jnp.bfloat16)                     # no-op if x is bf16
    h = hidden_layer(h, w1_ref, b1_ref)
    h = hidden_layer(h, w2_ref, b2_ref)
    h = hidden_layer(h, w3_ref, b3_ref)
    h = hidden_layer(h, w4_ref, b4_ref)
    # Output layer: f32 bias add on the accumulator, lane-dense (tb, 128) store.
    acc = jnp.dot(h, w5_ref[...], preferred_element_type=jnp.float32)
    out_ref[...] = acc + b5_ref[...]


# ----------------------------------------------------------------------------
# Parameters
# ----------------------------------------------------------------------------
def make_decoder_params(key, latent_dim=LATENT_DIM, input_dim=INPUT_DIM):
    """Deterministic init mimicking nn.Linear's U(-1/sqrt(fan_in), 1/sqrt(fan_in))."""
    dims = [latent_dim] + HIDDEN + [input_dim]
    params = []
    for i in range(len(dims) - 1):
        fan_in, fan_out = dims[i], dims[i + 1]
        key, kw, kb = jax.random.split(key, 3)
        bound = 1.0 / jnp.sqrt(jnp.float32(fan_in))
        w = jax.random.uniform(kw, (fan_in, fan_out), jnp.float32, -bound, bound)
        b = jax.random.uniform(kb, (1, fan_out), jnp.float32, -bound, bound)
        params.append((w, b))
    return params


def pad_and_cast_params(params):
    """Lane-pad narrow layers (64->128 hidden, 42->128 output) with exact zeros
    and cast weights to bf16. Biases stay f32 (cast in-kernel if needed)."""
    (w1, b1), (w2, b2), (w3, b3), (w4, b4), (w5, b5) = params

    # layer 1: pad output columns 64 -> 128 (extra cols are exact zeros)
    w1p = jnp.zeros((LATENT_DIM, H1_PAD), jnp.float32).at[:, :HIDDEN[0]].set(w1)
    b1p = jnp.zeros((1, H1_PAD), jnp.float32).at[:, :HIDDEN[0]].set(b1)
    # layer 2: pad input rows 64 -> 128 (zero rows contribute nothing)
    w2p = jnp.zeros((H1_PAD, HIDDEN[1]), jnp.float32).at[:HIDDEN[0], :].set(w2)
    # output layer: pad output columns 42 -> 128 (lane-dense stores)
    w5p = jnp.zeros((HIDDEN[3], OUT_PAD), jnp.float32).at[:, :INPUT_DIM].set(w5)
    b5p = jnp.zeros((1, OUT_PAD), jnp.float32).at[:, :INPUT_DIM].set(b5)

    padded = [(w1p, b1p), (w2p, b2), (w3, b3), (w4, b4), (w5p, b5p)]
    return [(w.astype(jnp.bfloat16), b) for w, b in padded]


# ----------------------------------------------------------------------------
# Wrapper plumbing
# ----------------------------------------------------------------------------
def _round_up(n, m):
    return ((n + m - 1) // m) * m


def _choose_tile(B, block_b):
    """Pick a batch tile: multiple of 256 (fills the 256-wide MXU, amortizes the
    ~0.35 us/grid-step overhead), preferring one that divides B (no jnp.pad
    copy) and leaving >= 2 grid steps for large batches (v7x: both TCs busy)."""
    block_b = max(256, (block_b // 256) * 256)
    if B <= 256:
        # Tiny batch: single step; launch/DMA overhead dominates regardless.
        return _round_up(B, 8)
    if B >= 512:
        upper = min(block_b, (B // 2) // 256 * 256)   # keep grid >= 2
    else:
        upper = 256
    upper = max(upper, 256)
    for tb in range(upper, 0, -256):
        if B % tb == 0:
            return tb
    return upper  # no multiple-of-256 divisor -> remainder handled by padding


@functools.lru_cache(maxsize=1)
def _default_bf16_epilogue():
    """bf16 epilogue on v6e/v7x; f32 on v5e and older (no bf16 VPU)."""
    try:
        kind = jax.devices()[0].device_kind.lower()
    except Exception:
        return False
    return not any(tag in kind for tag in ("v2", "v3", "v4", "v5"))


@functools.lru_cache(maxsize=1)
def _single_buffer_supported():
    """Probe once: does this JAX build accept pipeline_mode=pl.Buffered(1)?"""
    try:
        spec = pl.BlockSpec((8, 128), lambda i: (0, 0),
                            pipeline_mode=pl.Buffered(1))

        def copy_k(x_ref, o_ref):
            o_ref[...] = x_ref[...]

        x = jnp.arange(8 * 128, dtype=jnp.float32).reshape(8, 128)
        y = pl.pallas_call(
            copy_k,
            out_shape=jax.ShapeDtypeStruct((8, 128), jnp.float32),
            grid=(1,),
            in_specs=[spec],
            out_specs=pl.BlockSpec((8, 128), lambda i: (0, 0)),
        )(x)
        return bool(jnp.all(jax.block_until_ready(y) == x))
    except Exception:
        return False


@functools.partial(
    jax.jit,
    static_argnames=("tb", "bf16_epilogue", "single_buffer_weights"))
def _decoder_pallas(x_pad, flat_params, *, tb, bf16_epilogue,
                    single_buffer_weights):
    """x_pad: (b_pad, LATENT_DIM), b_pad % tb == 0 -> (b_pad, OUT_PAD) f32."""
    b_pad = x_pad.shape[0]
    grid = (b_pad // tb,)

    const = lambda i: (0, 0)
    if single_buffer_weights:
        # Constant index_map: weights/biases never change across grid steps, so
        # one VMEM buffer suffices (saves the redundant second copy + its DMA).
        def w_spec(shape):
            return pl.BlockSpec(shape, const, pipeline_mode=pl.Buffered(1))
    else:
        def w_spec(shape):
            return pl.BlockSpec(shape, const)

    in_specs = [pl.BlockSpec((tb, LATENT_DIM), lambda i: (i, 0))]
    for p in flat_params:
        in_specs.append(w_spec(p.shape))

    # Advisory cost hint for XLA's scheduler around the custom call.
    flops_per_row = 2 * (LATENT_DIM * H1_PAD + H1_PAD * HIDDEN[1]
                         + HIDDEN[1] * HIDDEN[2] + HIDDEN[2] * HIDDEN[3]
                         + HIDDEN[3] * OUT_PAD)
    x_bytes = x_pad.size * x_pad.dtype.itemsize
    param_bytes = sum(int(p.size) * p.dtype.itemsize for p in flat_params)
    out_bytes = b_pad * OUT_PAD * 4

    kernel = functools.partial(decoder_kernel, bf16_epilogue=bf16_epilogue)
    return pl.pallas_call(
        kernel,
        out_shape=jax.ShapeDtypeStruct((b_pad, OUT_PAD), jnp.float32),
        grid=grid,
        in_specs=in_specs,
        out_specs=pl.BlockSpec((tb, OUT_PAD), lambda i: (i, 0)),
        compiler_params=pltpu.CompilerParams(
            # Batch tiles are independent -> shard across v7x's 2 TensorCores.
            dimension_semantics=("parallel",),
            # Few MiB of resident weights + double-buffered activation tiles at
            # tb<=1024: comfortably within every chip's scoped VMEM (incl. v7x).
            vmem_limit_bytes=32 * 1024 * 1024,
        ),
        cost_estimate=pl.CostEstimate(
            flops=int(b_pad) * int(flops_per_row),
            transcendentals=0,
            bytes_accessed=int(x_bytes + param_bytes + out_bytes),
        ),
    )(x_pad, *flat_params)


def decoder_forward_padded(x, padded_params, block_b=512, bf16_epilogue=None):
    """x: (B, LATENT_DIM) f32 or bf16 -> raw padded (b_pad, OUT_PAD) f32 output.

    Columns >= INPUT_DIM are exact zeros; rows >= B (if any) are batch padding.
    Consumers that can read this layout directly avoid the extra HBM pass of a
    separate slice op. Passing x already in bf16 (from a fused producer) halves
    the dominant input DMA; the in-kernel cast is then a no-op.
    """
    B = x.shape[0]
    if bf16_epilogue is None:
        bf16_epilogue = _default_bf16_epilogue()
    tb = _choose_tile(B, block_b)
    b_pad = _round_up(B, tb)
    if b_pad != B:
        # Fallback only when no multiple-of-256 tile divides B exactly.
        x = jnp.pad(x, ((0, b_pad - B), (0, 0)))
    flat = tuple(p for wb in padded_params for p in wb)
    return _decoder_pallas(x, flat, tb=tb, bf16_epilogue=bool(bf16_epilogue),
                           single_buffer_weights=_single_buffer_supported())

    # TODO(synk): if production batch really is ~8, fuse this decoder into the
    # kernel that produces the latent (or batch multiple decoder calls) --
    # launch/DMA overhead dominates there and in-kernel tuning cannot help.


def decoder_forward(x, padded_params, block_b=512, bf16_epilogue=None):
    """(B, LATENT_DIM) -> (B, INPUT_DIM) f32. Note: the final slice is a
    separate XLA copy; production consumers should use decoder_forward_padded
    and fuse the slice (or read the padded layout) instead."""
    out = decoder_forward_padded(x, padded_params, block_b, bf16_epilogue)
    return out[:x.shape[0], :INPUT_DIM]


def decoder_ref(x, params):
    """Pure-JAX f32 reference (unpadded params)."""
    h = x
    for i, (w, b) in enumerate(params):
        h = h @ w + b
        if i < len(params) - 1:
            h = jnp.maximum(h, 0.0)
    return h


# ----------------------------------------------------------------------------
# Self-test
# ----------------------------------------------------------------------------
if __name__ == "__main__":
    key = jax.random.PRNGKey(0)
    key, kx1, kx2 = jax.random.split(key, 3)

    params = make_decoder_params(key)
    padded_params = pad_and_cast_params(params)

    # Small batch: single grid step (overhead-dominated regime).
    x_small = jax.random.normal(kx1, (8, LATENT_DIM), jnp.float32)
    out_small = jax.block_until_ready(decoder_forward(x_small, padded_params))
    ref_small = decoder_ref(x_small, params)
    assert out_small.shape == (8, INPUT_DIM)
    assert jnp.allclose(out_small, ref_small, atol=5e-2, rtol=5e-2), (
        "small-batch mismatch, max abs diff = "
        f"{jnp.max(jnp.abs(out_small - ref_small))}")

    # Larger batch: exercises the multi-tile grid path (tb=512 -> 2 parallel
    # steps, no jnp.pad since 512 divides 1024).
    x_big = jax.random.normal(kx2, (1024, LATENT_DIM), jnp.float32)
    out_big = jax.block_until_ready(decoder_forward(x_big, padded_params))
    ref_big = decoder_ref(x_big, params)
    assert out_big.shape == (1024, INPUT_DIM)
    assert jnp.allclose(out_big, ref_big, atol=5e-2, rtol=5e-2), (
        "big-batch mismatch, max abs diff = "
        f"{jnp.max(jnp.abs(out_big - ref_big))}")

    print("KERNEL_OK")
</pallas_src>

<mosaic_0001>
module attributes {stable_mosaic.version = 11 : i64} {
  func.func @copy_k(%arg0: i32, %arg1: memref<8x128xf32, #tpu.memory_space<vmem>>, %arg2: memref<8x128xf32, #tpu.memory_space<vmem>>) attributes {dimension_semantics = [#tpu.dimension_semantics<arbitrary>], iteration_bounds = array<i64: 1>, scalar_prefetch = 0 : i64, scratch_operands = 0 : i64, tpu.core_type = #tpu.core_type<tc>, window_params = [{pipeline_mode = #tpu.pipeline_mode<synchronous>, transform_indices = @transform_0, window_bounds = array<i64: 8, 128>}, {pipeline_mode = #tpu.pipeline_mode<synchronous>, transform_indices = @transform_1, window_bounds = array<i64: 8, 128>}]} {
    %c0 = arith.constant 0 : index
    %c0_0 = arith.constant 0 : index
    %0 = vector.load %arg1[%c0, %c0_0] : memref<8x128xf32, #tpu.memory_space<vmem>>, vector<8x128xf32>
    %c0_1 = arith.constant 0 : index
    %c0_2 = arith.constant 0 : index
    %1 = vector.load %arg2[%c0_1, %c0_2] : memref<8x128xf32, #tpu.memory_space<vmem>>, vector<8x128xf32>
    tpu.vector_store %arg2[%c0_1, %c0_2], %0 {strides = array<i32>} : memref<8x128xf32, #tpu.memory_space<vmem>>, vector<8x128xf32>,
    return
  }
  func.func @transform_0(%arg0: i32) -> (i32, i32) {
    %c0_i32 = arith.constant 0 : i32
    %c0_i32_0 = arith.constant 0 : i32
    %c0_i32_1 = arith.constant 0 : i32
    return %c0_i32, %c0_i32_0 : i32, i32
  }
  func.func @transform_1(%arg0: i32) -> (i32, i32) {
    %c0_i32 = arith.constant 0 : i32
    %c0_i32_0 = arith.constant 0 : i32
    %c0_i32_1 = arith.constant 0 : i32
    return %c0_i32, %c0_i32_0 : i32, i32
  }
}

module attributes {stable_mosaic.version = 11 : i64} {
  func.func @decoder_kernel(%arg0: i32, %arg1: memref<8x256xf32, #tpu.memory_space<vmem>>, %arg2: memref<256x128xbf16, #tpu.memory_space<vmem>>, %arg3: memref<1x128xf32, #tpu.memory_space<vmem>>, %arg4: memref<128x128xbf16, #tpu.memory_space<vmem>>, %arg5: memref<1x128xf32, #tpu.memory_space<vmem>>, %arg6: memref<128x256xbf16, #tpu.memory_space<vmem>>, %arg7: memref<1x256xf32, #tpu.memory_space<vmem>>, %arg8: memref<256x512xbf16, #tpu.memory_space<vmem>>, %arg9: memref<1x512xf32, #tpu.memory_space<vmem>>, %arg10: memref<512x128xbf16, #tpu.memory_space<vmem>>, %arg11: memref<1x128xf32, #tpu.memory_space<vmem>>, %arg12: memref<8x128xf32, #tpu.memory_space<vmem>>) attributes {dimension_semantics = [#tpu.dimension_semantics<parallel>], iteration_bounds = array<i64: 1>, scalar_prefetch = 0 : i64, scratch_operands = 0 : i64, tpu.core_type = #tpu.core_type<tc>, window_params = [{transform_indices = @transform_0, window_bounds = array<i64: 8, 256>}, {pipeline_mode = #tpu.pipeline_mode<synchronous>, transform_indices = @transform_1, window_bounds = array<i64: 256, 128>}, {pipeline_mode = #tpu.pipeline_mode<synchronous>, transform_indices = @transform_2, window_bounds = array<i64: 1, 128>}, {pipeline_mode = #tpu.pipeline_mode<synchronous>, transform_indices = @transform_3, window_bounds = array<i64: 128, 128>}, {pipeline_mode = #tpu.pipeline_mode<synchronous>, transform_indices = @transform_4, window_bounds = array<i64: 1, 128>}, {pipeline_mode = #tpu.pipeline_mode<synchronous>, transform_indices = @transform_5, window_bounds = array<i64: 128, 256>}, {pipeline_mode = #tpu.pipeline_mode<synchronous>, transform_indices = @transform_6, window_bounds = array<i64: 1, 256>}, {pipeline_mode = #tpu.pipeline_mode<synchronous>, transform_indices = @transform_7, window_bounds = array<i64: 256, 512>}, {pipeline_mode = #tpu.pipeline_mode<synchronous>, transform_indices = @transform_8, window_bounds = array<i64: 1, 512>}, {pipeline_mode = #tpu.pipeline_mode<synchronous>, transform_indices = @transform_9, window_bounds = array<i64: 512, 128>}, {pipeline_mode = #tpu.pipeline_mode<synchronous>, transform_indices = @transform_10, window_bounds = array<i64: 1, 128>}, {transform_indices = @transform_11, window_bounds = array<i64: 8, 128>}]} {
    %c0 = arith.constant 0 : index
    %c0_0 = arith.constant 0 : index
    %0 = vector.load %arg1[%c0, %c0_0] : memref<8x256xf32, #tpu.memory_space<vmem>>, vector<8x256xf32>
    %1 = arith.truncf %0 : vector<8x256xf32> to vector<8x256xbf16>
    %c0_1 = arith.constant 0 : index
    %c0_2 = arith.constant 0 : index
    %2 = vector.load %arg2[%c0_1, %c0_2] : memref<256x128xbf16, #tpu.memory_space<vmem>>, vector<256x128xbf16>
    %cst = arith.constant dense<0.000000e+00> : vector<8x128xf32>
    %3 = tpu.matmul %1, %2, %cst {dimension_numbers = #tpu.dot_dimension_numbers<[1], [0], [0], [1], [0, 0, 1, 1], [], []>} : vector<8x256xbf16>, vector<256x128xbf16>, vector<8x128xf32> -> vector<8x128xf32>
    %4 = arith.truncf %3 : vector<8x128xf32> to vector<8x128xbf16>
    %c0_3 = arith.constant 0 : index
    %c0_4 = arith.constant 0 : index
    %5 = vector.load %arg3[%c0_3, %c0_4] : memref<1x128xf32, #tpu.memory_space<vmem>>, vector<1x128xf32>
    %6 = arith.truncf %5 : vector<1x128xf32> to vector<1x128xbf16>
    %7 = vector.broadcast %6 : vector<1x128xbf16> to vector<8x128xbf16>
    %8 = arith.addf %4, %7 : vector<8x128xbf16>
    %cst_5 = arith.constant 0.000000e+00 : bf16
    %9 = vector.broadcast %cst_5 : bf16 to vector<8x128xbf16>
    %10 = arith.maximumf %8, %9 : vector<8x128xbf16>
    %c0_6 = arith.constant 0 : index
    %c0_7 = arith.constant 0 : index
    %11 = vector.load %arg4[%c0_6, %c0_7] : memref<128x128xbf16, #tpu.memory_space<vmem>>, vector<128x128xbf16>
    %cst_8 = arith.constant dense<0.000000e+00> : vector<8x128xf32>
    %12 = tpu.matmul %10, %11, %cst_8 {dimension_numbers = #tpu.dot_dimension_numbers<[1], [0], [0], [1], [0, 0, 1, 1], [], []>} : vector<8x128xbf16>, vector<128x128xbf16>, vector<8x128xf32> -> vector<8x128xf32>
    %13 = arith.truncf %12 : vector<8x128xf32> to vector<8x128xbf16>
    %c0_9 = arith.constant 0 : index
    %c0_10 = arith.constant 0 : index
    %14 = vector.load %arg5[%c0_9, %c0_10] : memref<1x128xf32, #tpu.memory_space<vmem>>, vector<1x128xf32>
    %15 = arith.truncf %14 : vector<1x128xf32> to vector<1x128xbf16>
    %16 = vector.broadcast %15 : vector<1x128xbf16> to vector<8x128xbf16>
    %17 = arith.addf %13, %16 : vector<8x128xbf16>
    %cst_11 = arith.constant 0.000000e+00 : bf16
    %18 = vector.broadcast %cst_11 : bf16 to vector<8x128xbf16>
    %19 = arith.maximumf %17, %18 : vector<8x128xbf16>
    %c0_12 = arith.constant 0 : index
    %c0_13 = arith.constant 0 : index
    %20 = vector.load %arg6[%c0_12, %c0_13] : memref<128x256xbf16, #tpu.memory_space<vmem>>, vector<128x256xbf16>
    %cst_14 = arith.constant dense<0.000000e+00> : vector<8x256xf32>
    %21 = tpu.matmul %19, %20, %cst_14 {dimension_numbers = #tpu.dot_dimension_numbers<[1], [0], [0], [1], [0, 0, 1, 1], [], []>} : vector<8x128xbf16>, vector<128x256xbf16>, vector<8x256xf32> -> vector<8x256xf32>
    %22 = arith.truncf %21 : vector<8x256xf32> to vector<8x256xbf16>
    %c0_15 = arith.constant 0 : index
    %c0_16 = arith.constant 0 : index
    %23 = vector.load %arg7[%c0_15, %c0_16] : memref<1x256xf32, #tpu.memory_space<vmem>>, vector<1x256xf32>
    %24 = arith.truncf %23 : vector<1x256xf32> to vector<1x256xbf16>
    %25 = vector.broadcast %24 : vector<1x256xbf16> to vector<8x256xbf16>
    %26 = arith.addf %22, %25 : vector<8x256xbf16>
    %cst_17 = arith.constant 0.000000e+00 : bf16
    %27 = vector.broadcast %cst_17 : bf16 to vector<8x256xbf16>
    %28 = arith.maximumf %26, %27 : vector<8x256xbf16>
    %c0_18 = arith.constant 0 : index
    %c0_19 = arith.constant 0 : index
    %29 = vector.load %arg8[%c0_18, %c0_19] : memref<256x512xbf16, #tpu.memory_space<vmem>>, vector<256x512xbf16>
    %cst_20 = arith.constant dense<0.000000e+00> : vector<8x512xf32>
    %30 = tpu.matmul %28, %29, %cst_20 {dimension_numbers = #tpu.dot_dimension_numbers<[1], [0], [0], [1], [0, 0, 1, 1], [], []>} : vector<8x256xbf16>, vector<256x512xbf16>, vector<8x512xf32> -> vector<8x512xf32>
    %31 = arith.truncf %30 : vector<8x512xf32> to vector<8x512xbf16>
    %c0_21 = arith.constant 0 : index
    %c0_22 = arith.constant 0 : index
    %32 = vector.load %arg9[%c0_21, %c0_22] : memref<1x512xf32, #tpu.memory_space<vmem>>, vector<1x512xf32>
    %33 = arith.truncf %32 : vector<1x512xf32> to vector<1x512xbf16>
    %34 = vector.broadcast %33 : vector<1x512xbf16> to vector<8x512xbf16>
    %35 = arith.addf %31, %34 : vector<8x512xbf16>
    %cst_23 = arith.constant 0.000000e+00 : bf16
    %36 = vector.broadcast %cst_23 : bf16 to vector<8x512xbf16>
    %37 = arith.maximumf %35, %36 : vector<8x512xbf16>
    %c0_24 = arith.constant 0 : index
    %c0_25 = arith.constant 0 : index
    %38 = vector.load %arg10[%c0_24, %c0_25] : memref<512x128xbf16, #tpu.memory_space<vmem>>, vector<512x128xbf16>
    %cst_26 = arith.constant dense<0.000000e+00> : vector<8x128xf32>
    %39 = tpu.matmul %37, %38, %cst_26 {dimension_numbers = #tpu.dot_dimension_numbers<[1], [0], [0], [1], [0, 0, 1, 1], [], []>} : vector<8x512xbf16>, vector<512x128xbf16>, vector<8x128xf32> -> vector<8x128xf32>
    %c0_27 = arith.constant 0 : index
    %c0_28 = arith.constant 0 : index
    %40 = vector.load %arg11[%c0_27, %c0_28] : memref<1x128xf32, #tpu.memory_space<vmem>>, vector<1x128xf32>
    %41 = vector.broadcast %40 : vector<1x128xf32> to vector<8x128xf32>
    %42 = arith.addf %39, %41 : vector<8x128xf32>
    %c0_29 = arith.constant 0 : index
    %c0_30 = arith.constant 0 : index
    %43 = vector.load %arg12[%c0_29, %c0_30] : memref<8x128xf32, #tpu.memory_space<vmem>>, vector<8x128xf32>
    tpu.vector_store %arg12[%c0_29, %c0_30], %42 {strides = array<i32>} : memref<8x128xf32, #tpu.memory_space<vmem>>, vector<8x128xf32>,
    return
  }
  func.func @transform_0(%arg0: i32) -> (i32, i32) {
    %c0_i32 = arith.constant 0 : i32
    %c0_i32_0 = arith.constant 0 : i32
    return %arg0, %c0_i32 : i32, i32
  }
  func.func @transform_1(%arg0: i32) -> (i32, i32) {
    %c0_i32 = arith.constant 0 : i32
    %c0_i32_0 = arith.constant 0 : i32
    %c0_i32_1 = arith.constant 0 : i32
    return %c0_i32, %c0_i32_0 : i32, i32
  }
  func.func @transform_2(%arg0: i32) -> (i32, i32) {
    %c0_i32 = arith.constant 0 : i32
    %c0_i32_0 = arith.constant 0 : i32
    %c0_i32_1 = arith.constant 0 : i32
    return %c0_i32, %c0_i32_0 : i32, i32
  }
  func.func @transform_3(%arg0: i32) -> (i32, i32) {
    %c0_i32 = arith.constant 0 : i32
    %c0_i32_0 = arith.constant 0 : i32
    %c0_i32_1 = arith.constant 0 : i32
    return %c0_i32, %c0_i32_0 : i32, i32
  }
  func.func @transform_4(%arg0: i32) -> (i32, i32) {
    %c0_i32 = arith.constant 0 : i32
    %c0_i32_0 = arith.constant 0 : i32
    %c0_i32_1 = arith.constant 0 : i32
    return %c0_i32, %c0_i32_0 : i32, i32
  }
  func.func @transform_5(%arg0: i32) -> (i32, i32) {
    %c0_i32 = arith.constant 0 : i32
    %c0_i32_0 = arith.constant 0 : i32
    %c0_i32_1 = arith.constant 0 : i32
    return %c0_i32, %c0_i32_0 : i32, i32
  }
  func.func @transform_6(%arg0: i32) -> (i32, i32) {
    %c0_i32 = arith.constant 0 : i32
    %c0_i32_0 = arith.constant 0 : i32
    %c0_i32_1 = arith.constant 0 : i32
    return %c0_i32, %c0_i32_0 : i32, i32
  }
  func.func @transform_7(%arg0: i32) -> (i32, i32) {
    %c0_i32 = arith.constant 0 : i32
    %c0_i32_0 = arith.constant 0 : i32
    %c0_i32_1 = arith.constant 0 : i32
    return %c0_i32, %c0_i32_0 : i32, i32
  }
  func.func @transform_8(%arg0: i32) -> (i32, i32) {
    %c0_i32 = arith.constant 0 : i32
    %c0_i32_0 = arith.constant 0 : i32
    %c0_i32_1 = arith.constant 0 : i32
    return %c0_i32, %c0_i32_0 : i32, i32
  }
  func.func @transform_9(%arg0: i32) -> (i32, i32) {
    %c0_i32 = arith.constant 0 : i32
    %c0_i32_0 = arith.constant 0 : i32
    %c0_i32_1 = arith.constant 0 : i32
    return %c0_i32, %c0_i32_0 : i32, i32
  }
  func.func @transform_10(%arg0: i32) -> (i32, i32) {
    %c0_i32 = arith.constant 0 : i32
    %c0_i32_0 = arith.constant 0 : i32
    %c0_i32_1 = arith.constant 0 : i32
    return %c0_i32, %c0_i32_0 : i32, i32
  }
  func.func @transform_11(%arg0: i32) -> (i32, i32) {
    %c0_i32 = arith.constant 0 : i32
    %c0_i32_0 = arith.constant 0 : i32
    return %arg0, %c0_i32 : i32, i32
  }
}

</mosaic_0001>

<bundles_post_ra>
// kernel: tpu_custom_call.1
= control target key start
LH: loop header
LB: loop body
LE: loop exit
PB: predicated region body
PF: predicated region fallthrough
CT: control target
= control target key end

     0   :  { %6 = vsyncpa [#allocation3], 0  ;;  %s102_s0 = inlined_call_operand.hbm [shape: f32[8,128], index: 0, kind: input, shape index: {}]   ;;  %s103_s1 = inlined_call_operand.hbm [shape: f32[8,128], index: 1, kind: output, shape index: {}]  }
   0x1   :  { %7 = vsyncpa [#allocation4], 0  ;;  %s84_s6 = smov [#allocation2]  }
   0x2   :  { %s14_s7 = sshll.u32 %s84_s6, 4  ;;  %s15_s7 = int_to_ptr.vmem [resolvable:$true] %s14_s7 }
   0x3   :  { %s48_s8 = scalar_lea.vmem %s15_s7, 128  ;;  %p53_p1 = scmp.lt.s32.totalorder %s15_s7, %s15_s7 }
   0x4   :  { %p49_p0 = scmp.ne.s32.totalorder %s15_s7, %s48_s8  ;;  %p54_p2 = scmp.lt.s32.totalorder %s48_s8, %s48_s8 }
   0x6   :  { %p55_p3 = por %p54_p2, %p53_p1 }
   0x8   :  { %p56_p4 = pnand %p55_p3, %p49_p0 }
   0xa   :  { %59 = shalt.err (!%p56_p4)
}
   0xb   :  { %17 = dma.hbm_to_vmem [thread:$0]  %s102_s0, 128, %s15_s7, [#allocation3]  }
   0xc   :  { %80 = dma.done.wait [#allocation3], 128  }
   0xd   :  { %81 = vsyncadd [#allocation3], 4294967168  ;;  %s85_s11 = smov [#allocation5]   ;;  %v21_v0 = vld [vmem:[#allocation2] sm:$0xff] }
   0xe   :  { %s29_s12 = sshll.u32 %s85_s11, 4  ;;  %22 = vst [vmem:[#allocation5] sm:$0xff] %v21_v0  ;;  %s30_s12 = int_to_ptr.vmem [resolvable:$true] %s29_s12 }
   0xf   :  { %s60_s13 = scalar_lea.vmem %s30_s12, 128  ;;  %p65_p6 = scmp.lt.s32.totalorder %s30_s12, %s30_s12 }
  0x10   :  { %p61_p5 = scmp.ne.s32.totalorder %s30_s12, %s60_s13  ;;  %p66_p7 = scmp.lt.s32.totalorder %s60_s13, %s60_s13 }
  0x12   :  { %p67_p8 = por %p66_p7, %p65_p6 }
  0x14   :  { %p68_p9 = pnand %p67_p8, %p61_p5 }
  0x16   :  { %71 = shalt.err (!%p68_p9)
}
  0x17   :  { %32 = dma.vmem_to_hbm [thread:$0]  %s30_s12, 128, %s103_s1, [#allocation4]  }
  0x18   :  { %82 = dma.done.wait [#allocation4], 128  }
  0x19   :  { %83 = vsyncadd [#allocation4], 4294967168 }
  0x1a   :  { %36 = vsyncpa [#allocation3], 1 }
  0x1b   :  { %37 = vsyncpa [#allocation4], 1 }

// kernel: _decoder_pallas.1
= control target key start
LH: loop header
LB: loop body
LE: loop exit
PB: predicated region body
PF: predicated region fallthrough
CT: control target
= control target key end

     0   :  { %16 = vsyncpa [#allocation3], 0  ;;  %s2253_s0 = inlined_call_operand.hbm [shape: f32[8,256], index: 0, kind: input, shape index: {}]   ;;  %s2254_s1 = inlined_call_operand.hbm [shape: bf16[256,128], index: 1, kind: input, shape index: {}]   ;;  %s2255_s2 = inlined_call_operand.vmem [shape: f32[1,128], index: 2, kind: input, shape index: {}]   ;;  %s2256_s3 = inlined_call_operand.hbm [shape: bf16[128,128], index: 3, kind: input, shape index: {}]   ;;  %s2257_s4 = inlined_call_operand.hbm [shape: f32[1,128], index: 4, kind: input, shape index: {}]   ;;  %s2258_s5 = inlined_call_operand.hbm [shape: bf16[128,256], index: 5, kind: input, shape index: {}]   ;;  %s2259_s6 = inlined_call_operand.vmem [shape: f32[1,256], index: 6, kind: input, shape index: {}]   ;;  %s2260_s7 = inlined_call_operand.hbm [shape: bf16[256,512], index: 7, kind: input, shape index: {}]   ;;  %s2261_s8 = inlined_call_operand.vmem [shape: f32[1,512], index: 8, kind: input, shape index: {}]   ;;  %s2262_s9 = inlined_call_operand.hbm [shape: bf16[512,128], index: 9, kind: input, shape index: {}]   ;;  %s2263_s10 = inlined_call_operand.vmem [shape: f32[1,128], index: 10, kind: input, shape index: {}]   ;;  %s2264_s11 = inlined_call_operand.hbm [shape: f32[8,128], index: 11, kind: output, shape index: {}]  }
   0x1   :  { %17 = vsyncpa [#allocation6], 0 }
   0x2   :  { %18 = vsyncpa [#allocation9], 0 }
   0x3   :  { %19 = vsyncpa [#allocation12], 0 }
   0x4   :  { %20 = vsyncpa [#allocation4], 0  ;;  %s2091_s17 = smov [#allocation5]  }
   0x5   :  { %s36_s18 = sshll.u32 %s2091_s17, 4  ;;  %s37_s18 = int_to_ptr.vmem [resolvable:$true] %s36_s18 }
   0x6   :  { %s1929_s19 = scalar_lea.vmem %s37_s18, 2048  ;;  %p1934_p1 = scmp.lt.s32.totalorder %s37_s18, %s37_s18 }
   0x7   :  { %p1930_p0 = scmp.ne.s32.totalorder %s37_s18, %s1929_s19  ;;  %p1935_p2 = scmp.lt.s32.totalorder %s1929_s19, %s1929_s19 }
   0x9   :  { %p1936_p3 = por %p1935_p2, %p1934_p1 }
   0xb   :  { %p1937_p4 = pnand %p1936_p3, %p1930_p0 }
   0xd   :  { %1940 = shalt.err (!%p1937_p4)
}
   0xe   :  { %s2092_s20 = smov 64   ;;  %s2093_s21 = smov 4  }
   0xf   :  { %42 = dma.hbm_to_vmem [thread:$0]  %s2254_s1, 2048, %s37_s18, [#allocation6], %s2092_s20, %s2092_s20, %s2093_s21  }
  0x10   :  { %s2094_s24 = smov [#allocation8]   ;;  %s2095_s26 = smov [#allocation11]  }
  0x11   :  { %s63_s25 = sshll.u32 %s2094_s24, 4  ;;  %s86_s27 = sshll.u32 %s2095_s26, 4  ;;  %s64_s25 = int_to_ptr.vmem [resolvable:$true] %s63_s25  ;;  %s87_s27 = int_to_ptr.vmem [resolvable:$true] %s86_s27 }
  0x12   :  { %s1949_s28 = scalar_lea.vmem %s64_s25, 16  ;;  %s1953_s29 = scalar_lea.vmem %s64_s25, 32 }
  0x13   :  { %p1950_p5 = scmp.ne.s32.totalorder %s64_s25, %s1949_s28  ;;  %p1954_p6 = scmp.lt.s32.totalorder %s64_s25, %s64_s25 }
  0x14   :  { %p1955_p7 = scmp.lt.s32.totalorder %s1953_s29, %s1949_s28 }
  0x16   :  { %p1956_p8 = por %p1955_p7, %p1954_p6 }
  0x18   :  { %p1957_p9 = pnand %p1956_p8, %p1950_p5 }
  0x1a   :  { %1960 = shalt.err (!%p1957_p9)
}
  0x1b   :  { %66 = dma.hbm_to_vmem [thread:$0]  %s2257_s4, 16, %s64_s25, [#allocation9]  }
  0x1c   :  { %s1969_s13 = scalar_lea.vmem %s87_s27, 8192  ;;  %p1974_p11 = scmp.lt.s32.totalorder %s87_s27, %s87_s27 }
  0x1d   :  { %p1970_p10 = scmp.ne.s32.totalorder %s87_s27, %s1969_s13  ;;  %p1975_p12 = scmp.lt.s32.totalorder %s1969_s13, %s1969_s13 }
  0x1f   :  { %p1976_p13 = por %p1975_p12, %p1974_p11 }
  0x21   :  { %p1977_p0 = pnand %p1976_p13, %p1970_p10 }
  0x23   :  { %1980 = shalt.err (!%p1977_p0)
}
  0x24   :  { %s2096_s1 = smov 256   ;;  %s2097_s14 = smov 16  }
  0x25   :  { %92 = dma.hbm_to_vmem [thread:$0]  %s2260_s7, 8192, %s87_s27, [#allocation12], %s2096_s1, %s2096_s1, %s2097_s14  }
  0x26   :  { %s2098_s17 = smov [#allocation2]   ;;  %s2099_s19 = smov [#allocation7]  }
  0x27   :  { %s27_s18 = sshll.u32 %s2098_s17, 4  ;;  %s50_s22 = sshll.u32 %s2099_s19, 4  ;;  %s28_s18 = int_to_ptr.vmem [resolvable:$true] %s27_s18  ;;  %s51_s22 = int_to_ptr.vmem [resolvable:$true] %s50_s22 }
  0x28   :  { %s1989_s4 = scalar_lea.vmem %s28_s18, 256  ;;  %p1994_p2 = scmp.lt.s32.totalorder %s28_s18, %s28_s18 }
  0x29   :  { %p1990_p1 = scmp.ne.s32.totalorder %s28_s18, %s1989_s4  ;;  %p1995_p3 = scmp.lt.s32.totalorder %s1989_s4, %s1989_s4 }
  0x2b   :  { %p1996_p4 = por %p1995_p3, %p1994_p2 }
  0x2d   :  { %p1997_p5 = pnand %p1996_p4, %p1990_p1 }
  0x2f   :  { %2000 = shalt.err (!%p1997_p5)
}
  0x30   :  { %30 = dma.hbm_to_vmem [thread:$0]  %s2253_s0, 256, %s28_s18, [#allocation3]  }
  0x31   :  { %s2009_s25 = scalar_lea.vmem %s51_s22, 1024  ;;  %p2014_p7 = scmp.lt.s32.totalorder %s51_s22, %s51_s22 }
  0x32   :  { %p2010_p6 = scmp.ne.s32.totalorder %s51_s22, %s2009_s25  ;;  %p2015_p8 = scmp.lt.s32.totalorder %s2009_s25, %s2009_s25 }
  0x34   :  { %p2016_p9 = por %p2015_p8, %p2014_p7 }
  0x36   :  { %p2017_p10 = pnand %p2016_p9, %p2010_p6 }
  0x38   :  { %2020 = shalt.err (!%p2017_p10)
}
  0x39   :  { %56 = dma.hbm_to_vmem [thread:$0]  %s2256_s3, 1024, %s51_s22, [#allocation6], %s2092_s20, %s2092_s20, %s2093_s21  }
  0x3a   :  { %s2100_s27 = smov [#allocation10]  }
  0x3b   :  { %s72_s28 = sshll.u32 %s2100_s27, 4  ;;  %s73_s28 = int_to_ptr.vmem [resolvable:$true] %s72_s28 }
  0x3c   :  { %s2029_s29 = scalar_lea.vmem %s73_s28, 2048  ;;  %p2034_p12 = scmp.lt.s32.totalorder %s73_s28, %s73_s28 }
  0x3d   :  { %p2030_p11 = scmp.ne.s32.totalorder %s73_s28, %s2029_s29  ;;  %p2035_p13 = scmp.lt.s32.totalorder %s2029_s29, %s2029_s29 }
  0x3f   :  { %p2036_p0 = por %p2035_p13, %p2034_p12 }
  0x41   :  { %p2037_p1 = pnand %p2036_p0, %p2030_p11 }
  0x43   :  { %2040 = shalt.err (!%p2037_p1)
}
  0x44   :  { %s2101_s0 = smov 128   ;;  %s2102_s30 = smov 8  }
  0x45   :  { %78 = dma.hbm_to_vmem [thread:$0]  %s2258_s5, 2048, %s73_s28, [#allocation9], %s2101_s0, %s2101_s0, %s2102_s30  }
  0x46   :  { %s2103_s1 = smov [#allocation13]  }
  0x47   :  { %s100_s14 = sshll.u32 %s2103_s1, 4  ;;  %s101_s14 = int_to_ptr.vmem [resolvable:$true] %s100_s14 }
  0x48   :  { %s2049_s3 = scalar_lea.vmem %s101_s14, 4096  ;;  %p2054_p3 = scmp.lt.s32.totalorder %s101_s14, %s101_s14 }
  0x49   :  { %p2050_p2 = scmp.ne.s32.totalorder %s101_s14, %s2049_s3  ;;  %p2055_p4 = scmp.lt.s32.totalorder %s2049_s3, %s2049_s3 }
  0x4b   :  { %p2056_p5 = por %p2055_p4, %p2054_p3 }
  0x4d   :  { %p2057_p6 = pnand %p2056_p5, %p2050_p2 }
  0x4f   :  { %2060 = shalt.err (!%p2057_p6)
}
  0x50   :  { %106 = dma.hbm_to_vmem [thread:$0]  %s2262_s9, 4096, %s101_s14, [#allocation12], %s2092_s20, %s2092_s20, %s2093_s21  }
  0x51   :  { %2081 = dma.done.wait [#allocation3], 256  }
  0x52   :  { %2082 = vsyncadd [#allocation3], 4294967040 }
  0x53   :  { %2083 = dma.done.wait [#allocation6], 3072  }
  0x54   :  { %2084 = vsyncadd [#allocation6], 4294964224 }
  0x55   :  { %2085 = dma.done.wait [#allocation9], 2064  }
  0x56   :  { %2086 = vsyncadd [#allocation9], 4294965232 }
  0x57   :  { %2087 = dma.done.wait [#allocation12], 12288  }
  0x58   :  { %2088 = vsyncadd [#allocation12], 4294955008  ;;  %v2104_v0 = vmov 0.0   ;;  %v1745_v1 = vld [vmem:[#allocation5 + $0x78] sm:$0xff]   ;;  %v1747_v3 = vld [vmem:[#allocation5 + $0x70] sm:$0xff]   ;;  %vm2105_vm0 = vmmov 0   ;;  %v309_v44 = vlaneseq }
  0x59   :  { %1708 = vmatprep.subr.bf16.mxu1 %v2104_v0  ;;  %v1746_v2 = vld [vmem:[#allocation5 + $0x38] sm:$0xff]   ;;  %1633 = vmatprep.subr.bf16.mxu0 %v1745_v1  ;;  %v1748_v4 = vld [vmem:[#allocation5 + $0x30] sm:$0xff]   ;;  %v1749_v5 = vld [vmem:[#allocation5 + $0x68] sm:$0xff]   ;;  %v2106_v29 = vmov 0   ;;  %s2107_s18 = smov [#allocation14]  }
  0x5a   :  { %1634 = vmatpush3.bf16.msra.mxu0 %v1746_v2  ;;  %v1750_v6 = vld [vmem:[#allocation5 + $0x28] sm:$0xff]   ;;  %v1751_v7 = vld [vmem:[#allocation5 + $0x60] sm:$0xff]   ;;  %v1753_v9 = vld [vmem:[#allocation5 + $0x58] sm:$0xff]   ;;  %1724 = vmatprep.mubr.msk.bf16.mxu1 %vm2105_vm0, %v2104_v0  ;;  %v2211_v47 = vshrl.u32 %v309_v44, 7  ;;  %s1484_s19 = sshll.u32 %s2107_s18, 4  ;;  %s1485_s19 = int_to_ptr.vmem [resolvable:$true] %s1484_s19 }
  0x5b   :  { %1635 = vmatprep.subr.bf16.mxu0 %v1747_v3  ;;  %v1752_v8 = vld [vmem:[#allocation5 + $0x20] sm:$0xff]   ;;  %v1754_v10 = vld [vmem:[#allocation5 + $0x18] sm:$0xff]   ;;  %v1755_v11 = vld [vmem:[#allocation5 + $0x50] sm:$0xff]   ;;  %s2061_s22 = scalar_lea.vmem %s1485_s19, 128  ;;  %p2066_p8 = scmp.lt.s32.totalorder %s1485_s19, %s1485_s19 }
  0x5c   :  { %v132_v12 = vld [vmem:[#allocation2 + $0x8] sm:$0xff]  ;;  %v1756_v15 = vld [vmem:[#allocation5 + $0x10] sm:$0xff]   ;;  %v1757_v16 = vld [vmem:[#allocation5 + $0x48] sm:$0xff]   ;;  %v2214_v49 = vsub.s32 0, %v2211_v47  ;;  %p2062_p7 = scmp.ne.s32.totalorder %s1485_s19, %s2061_s22  ;;  %p2067_p9 = scmp.lt.s32.totalorder %s2061_s22, %s2061_s22 }
  0x5d   :  { %v134_v13 = vpack.c.bf16 %v132_v12, %v132_v12  ;;  %v1761_v14 = vld [vmem:[#allocation7 + $0x38] sm:$0xff]   ;;  %v1762_v17 = vld [vmem:[#allocation7 + $0x30] sm:$0xff]   ;;  %v1758_v18 = vld [vmem:[#allocation5 + $0x8] sm:$0xff]  }
  0x5e   :  { %1636 = vmatpush3.bf16.msra.mxu0 %v1748_v4  ;;  %1709 = vmatpush3.bf16.msra.mxu1 %v1761_v14  ;;  %v1759_v19 = vld [vmem:[#allocation5 + $0x40] sm:$0xff]   ;;  %v1763_v20 = vld [vmem:[#allocation7 + $0x28] sm:$0xff]   ;;  %v131_v22 = vld [vmem:[#allocation2] sm:$0xff]  ;;  %p2068_p10 = por %p2067_p9, %p2066_p8 }
  0x5f   :  { %1637 = vmatprep.subr.bf16.mxu0 %v1749_v5  ;;  %295 = vmatprep.mubr.bf16.mxu0 %v134_v13  ;;  %v1760_v21 = vld [vmem:[#allocation5] sm:$0xff]   ;;  %v133_v24 = vpack.c.bf16 %v131_v22, %v131_v22  ;;  %v1765_v25 = vld [vmem:[#allocation7 + $0x18] sm:$0xff]   ;;  %v1766_v26 = vld [vmem:[#allocation7 + $0x10] sm:$0xff]  }
  0x60   :  { %1710 = vmatprep.subr.bf16.mxu1 %v2104_v0  ;;  %v1764_v23 = vld [vmem:[#allocation7 + $0x20] sm:$0xff]   ;;  %v1767_v27 = vld [vmem:[#allocation7 + $0x8] sm:$0xff]   ;;  %v1769_v30 = vld [vmem:[#allocation10 + $0x70] ss:$8 sps:$4 sm:$0xff]   ;;  %p2069_p11 = pnand %p2068_p10, %p2062_p7 }
  0x61   :  { %v1768_v28 = vld [vmem:[#allocation7] sm:$0xff]   ;;  %v1775_v35 = vld [vmem:[#allocation10 + $0x50] ss:$8 sps:$4 sm:$0xff]   ;;  %v304_v45 = vld [vmem:[%s2255_s2] sm:$0x1] }
  0x62   :  { %1638 = vmatpush3.bf16.msra.mxu0 %v1750_v6  ;;  %1711 = vmatpush3.bf16.msra.mxu1 %v1762_v17  ;;  %v1771_v31 = vld [vmem:[#allocation10 + $0x74] ss:$8 sps:$4 sm:$0xff]   ;;  %v1774_v32 = vld [vmem:[#allocation10 + $0x64] ss:$8 sps:$4 sm:$0xff]   ;;  %v1772_v33 = vld [vmem:[#allocation10 + $0x60] ss:$8 sps:$4 sm:$0xff]   ;;  %v305_v46 = vpack.c.bf16 %v304_v45, %v304_v45 }
  0x63   :  { %1639 = vmatprep.subr.bf16.mxu0 %v1751_v7  ;;  %1712 = vmatprep.subr.bf16.mxu1 %v2104_v0  ;;  %v1777_v34 = vld [vmem:[#allocation10 + $0x54] ss:$8 sps:$4 sm:$0xff]   ;;  %v1780_v36 = vld [vmem:[#allocation10 + $0x44] ss:$8 sps:$4 sm:$0xff]   ;;  %v1778_v37 = vld [vmem:[#allocation10 + $0x40] ss:$8 sps:$4 sm:$0xff]  }
  0x64   :  { %v1783_v38 = vld [vmem:[#allocation10 + $0x34] ss:$8 sps:$4 sm:$0xff]   ;;  %v1781_v39 = vld [vmem:[#allocation10 + $0x30] ss:$8 sps:$4 sm:$0xff]   ;;  %v1786_v40 = vld [vmem:[#allocation10 + $0x24] ss:$8 sps:$4 sm:$0xff]   ;;  %v307_v48 = vpack.i.b16 %v305_v46, %v305_v46 }
  0x65   :  { %v1784_v41 = vld [vmem:[#allocation10 + $0x20] ss:$8 sps:$4 sm:$0xff]   ;;  %v1789_v42 = vld [vmem:[#allocation10 + $0x14] ss:$8 sps:$4 sm:$0xff]   ;;  %v1787_v43 = vld [vmem:[#allocation10 + $0x10] ss:$8 sps:$4 sm:$0xff]  }
  0x66   :  { %1640 = vmatpush3.bf16.msra.mxu0 %v1752_v8  ;;  %1713 = vmatpush3.bf16.msra.mxu1 %v1763_v20  ;;  %v312_v53 = vrot.slane %v307_v48, %v2214_v49  ;;  %v1792_v59 = vld [vmem:[#allocation10 + $0x4] ss:$8 sps:$4 sm:$0xff]   ;;  %v1790_v60 = vld [vmem:[#allocation10] ss:$8 sps:$4 sm:$0xff]  }
  0x67   :  { %1641 = vmatprep.subr.bf16.mxu0 %v1753_v9  ;;  %1714 = vmatprep.subr.bf16.mxu1 %v2104_v0  ;;  %v1793_v61 = vld [vmem:[#allocation11 + $0xe0] ss:$16 sps:$4 sm:$0xff]   ;;  %v1795_v62 = vld [vmem:[#allocation11 + $0xe4] ss:$16 sps:$4 sm:$0xff]   ;;  %v1798_v63 = vld [vmem:[#allocation11 + $0xec] ss:$16 sps:$4 sm:$0xff]  }
  0x68   :  { %v1799_v1 = vld [vmem:[#allocation11 + $0xc0] ss:$16 sps:$4 sm:$0xff]   ;;  %v1807_v2 = vld [vmem:[#allocation11 + $0xa4] ss:$16 sps:$4 sm:$0xff]   ;;  %v1814_v44 = vld [vmem:[#allocation11 + $0x88] ss:$16 sps:$4 sm:$0xff]  }
  0x69   :  { %v1805_v3 = vld [vmem:[#allocation11 + $0xa0] ss:$16 sps:$4 sm:$0xff]   ;;  %v1813_v4 = vld [vmem:[#allocation11 + $0x84] ss:$16 sps:$4 sm:$0xff]   ;;  %v1822_v45 = vld [vmem:[#allocation11 + $0x6c] ss:$16 sps:$4 sm:$0xff]  }
  0x6a   :  { %1642 = vmatpush3.bf16.msra.mxu0 %v1754_v10  ;;  %1715 = vmatpush3.bf16.msra.mxu1 %v1764_v23  ;;  %v1811_v5 = vld [vmem:[#allocation11 + $0x80] ss:$16 sps:$4 sm:$0xff]   ;;  %v1819_v6 = vld [vmem:[#allocation11 + $0x64] ss:$16 sps:$4 sm:$0xff]   ;;  %v1820_v46 = vld [vmem:[#allocation11 + $0x68] ss:$16 sps:$4 sm:$0xff]  }
  0x6b   :  { %1643 = vmatprep.subr.bf16.mxu0 %v1755_v11  ;;  %1716 = vmatprep.subr.bf16.mxu1 %v2104_v0  ;;  %v1817_v7 = vld [vmem:[#allocation11 + $0x60] ss:$16 sps:$4 sm:$0xff]   ;;  %v1825_v8 = vld [vmem:[#allocation11 + $0x44] ss:$16 sps:$4 sm:$0xff]   ;;  %v1828_v48 = vld [vmem:[#allocation11 + $0x4c] ss:$16 sps:$4 sm:$0xff]  }
  0x6c   :  { %v1823_v9 = vld [vmem:[#allocation11 + $0x40] ss:$16 sps:$4 sm:$0xff]   ;;  %v1831_v10 = vld [vmem:[#allocation11 + $0x24] ss:$16 sps:$4 sm:$0xff]  }
  0x6d   :  { %v1829_v11 = vld [vmem:[#allocation11 + $0x20] ss:$16 sps:$4 sm:$0xff]   ;;  %v1837_v12 = vld [vmem:[#allocation11 + $0x4] ss:$16 sps:$4 sm:$0xff]  }
  0x6e   :  { %1644 = vmatpush3.bf16.msra.mxu0 %v1756_v15  ;;  %1717 = vmatpush3.bf16.msra.mxu1 %v1765_v25  ;;  %v1835_v13 = vld [vmem:[#allocation11] ss:$16 sps:$4 sm:$0xff]   ;;  %v1843_v14 = vld [vmem:[#allocation11 + $0x1e4] ss:$16 sps:$4 sm:$0xff]  }
  0x6f   :  { %1645 = vmatprep.subr.bf16.mxu0 %v1757_v16  ;;  %1718 = vmatprep.subr.bf16.mxu1 %v2104_v0  ;;  %v1841_v15 = vld [vmem:[#allocation11 + $0x1e0] ss:$16 sps:$4 sm:$0xff]   ;;  %v1849_v16 = vld [vmem:[#allocation11 + $0x1c4] ss:$16 sps:$4 sm:$0xff]  }
  0x70   :  { %v1847_v17 = vld [vmem:[#allocation11 + $0x1c0] ss:$16 sps:$4 sm:$0xff]   ;;  %v1861_v20 = vld [vmem:[#allocation11 + $0x184] ss:$16 sps:$4 sm:$0xff]  }
  0x71   :  { %v1867_v22 = vld [vmem:[#allocation11 + $0x164] ss:$16 sps:$4 sm:$0xff]   ;;  %v1865_v23 = vld [vmem:[#allocation11 + $0x160] ss:$16 sps:$4 sm:$0xff]  }
  0x72   :  { %1646 = vmatpush3.bf16.msra.mxu0 %v1758_v18  ;;  %1719 = vmatpush3.bf16.msra.mxu1 %v1766_v26  ;;  %v1855_v18 = vld [vmem:[#allocation11 + $0x1a4] ss:$16 sps:$4 sm:$0xff]   ;;  %v1871_v25 = vld [vmem:[#allocation11 + $0x140] ss:$16 sps:$4 sm:$0xff]   ;;  %v420_v26 = vld [vmem:[#allocation8] sm:$0x1] }
  0x73   :  { %1647 = vmatprep.subr.bf16.mxu0 %v1759_v19  ;;  %1720 = vmatprep.subr.bf16.mxu1 %v2104_v0  ;;  %v1853_v19 = vld [vmem:[#allocation11 + $0x1a0] ss:$16 sps:$4 sm:$0xff]  }
  0x76   :  { %1648 = vmatpush3.bf16.msra.mxu0 %v1760_v21  ;;  %1721 = vmatpush3.bf16.msra.mxu1 %v1767_v27  ;;  %v1859_v21 = vld [vmem:[#allocation11 + $0x180] ss:$16 sps:$4 sm:$0xff]   ;;  %v421_v27 = vpack.c.bf16 %v420_v26, %v420_v26 }
  0x77   :  { %1722 = vmatprep.subr.bf16.mxu1 %v2104_v0  ;;  %527 = vmatprep.subr.bf16.mxu0 %v1771_v31  ;;  %v1801_v0 = vld [vmem:[#allocation11 + $0xc4] ss:$16 sps:$4 sm:$0xff]  }
  0x79   :  { %296 = vmatmul.mubr.bf16.vlgmr.msra.gmra.mxu0 %v133_v24  ;;  %v1873_v24 = vld [vmem:[#allocation11 + $0x144] ss:$16 sps:$4 sm:$0xff]  }
  0x7a   :  { %1723 = vmatpush3.bf16.msra.mxu1 %v1768_v28  ;;  %559 = vmatprep.mubr.bf16.mxu0 %v2106_v29  ;;  %v423_v28 = vpack.i.b16 %v421_v27, %v421_v27 }
  0x7b   :  { %528 = vmatpush1.bf16.msra.mxu0 %v1769_v30  ;;  %986 = vmatprep.subr.bf16.mxu1 %v1795_v62  ;;  %v1862_v62 = vld [vmem:[#allocation11 + $0x188] ss:$16 sps:$4 sm:$0xff]  }
  0x7c   :  { %529 = vmatprep.subr.bf16.mxu0 %v1774_v32  ;;  %v428_v30 = vrot.slane %v423_v28, %v2214_v49 }
  0x7f   :  { %530 = vmatpush1.bf16.msra.mxu0 %v1772_v33 }
  0x80   :  { %531 = vmatprep.subr.bf16.mxu0 %v1777_v34 }
  0x83   :  { %532 = vmatpush1.bf16.msra.mxu0 %v1775_v35 }
  0x84   :  { %533 = vmatprep.subr.bf16.mxu0 %v1780_v36  ;;  %v1796_v36 = vld [vmem:[#allocation11 + $0xe8] ss:$16 sps:$4 sm:$0xff]  }
  0x87   :  { %534 = vmatpush1.bf16.msra.mxu0 %v1778_v37 }
  0x88   :  { %535 = vmatprep.subr.bf16.mxu0 %v1783_v38  ;;  %v1804_v38 = vld [vmem:[#allocation11 + $0xcc] ss:$16 sps:$4 sm:$0xff]  }
  0x8b   :  { %536 = vmatpush1.bf16.msra.mxu0 %v1781_v39 }
  0x8c   :  { %537 = vmatprep.subr.bf16.mxu0 %v1786_v40  ;;  %v1802_v40 = vld [vmem:[#allocation11 + $0xc8] ss:$16 sps:$4 sm:$0xff]  }
  0x8f   :  { %538 = vmatpush1.bf16.msra.mxu0 %v1784_v41  ;;  %v1810_v41 = vld [vmem:[#allocation11 + $0xac] ss:$16 sps:$4 sm:$0xff]  }
  0x90   :  { %539 = vmatprep.subr.bf16.mxu0 %v1789_v42  ;;  %v1808_v42 = vld [vmem:[#allocation11 + $0xa8] ss:$16 sps:$4 sm:$0xff]  }
  0x93   :  { %540 = vmatpush1.bf16.msra.mxu0 %v1787_v43  ;;  %v1816_v43 = vld [vmem:[#allocation11 + $0x8c] ss:$16 sps:$4 sm:$0xff]  }
  0x94   :  { %541 = vmatprep.subr.bf16.mxu0 %v1792_v59  ;;  %v1858_v59 = vld [vmem:[#allocation11 + $0x1ac] ss:$16 sps:$4 sm:$0xff]  }
  0x97   :  { %542 = vmatpush1.bf16.msra.mxu0 %v1790_v60  ;;  %v1856_v60 = vld [vmem:[#allocation11 + $0x1a8] ss:$16 sps:$4 sm:$0xff]  }
  0x98   :  { %1027 = vmatprep.subr.bf16.mxu0 %v1798_v63  ;;  %v1870_v63 = vld [vmem:[#allocation11 + $0x16c] ss:$16 sps:$4 sm:$0xff]  }
 0x139   :  { %v1649_v50 = vpop.f32.mrf.mxu0 }
 0x13b   :  { %v1650_v51 = vpop.f32.mrf.mxu0 }
 0x13c   :  { %v1651_v52 = vadd.f32 %v1650_v51, %v1649_v50  ;;  %v1826_v50 = vld [vmem:[#allocation11 + $0x48] ss:$16 sps:$4 sm:$0xff]   ;;  %v1834_v51 = vld [vmem:[#allocation11 + $0x2c] ss:$16 sps:$4 sm:$0xff]  }
 0x13d   :  { %v1652_v54 = vpop.f32.mrf.mxu0 }
 0x13e   :  { %v303_v55 = vpack.c.bf16 %v1651_v52, %v1651_v52  ;;  %v1832_v52 = vld [vmem:[#allocation11 + $0x28] ss:$16 sps:$4 sm:$0xff]  }
 0x13f   :  { %v1653_v56 = vpop.f32.mrf.mxu0  ;;  %v1838_v54 = vld [vmem:[#allocation11 + $0x8] ss:$16 sps:$4 sm:$0xff]  }
 0x140   :  { %v313_v57 = vadd.bf16 %v312_v53, %v303_v55  ;;  %v1840_v53 = vld [vmem:[#allocation11 + $0xc] ss:$16 sps:$4 sm:$0xff]   ;;  %v1844_v56 = vld [vmem:[#allocation11 + $0x1e8] ss:$16 sps:$4 sm:$0xff]  }
 0x141   :  { %v1846_v55 = vld [vmem:[#allocation11 + $0x1ec] ss:$16 sps:$4 sm:$0xff]  }
 0x142   :  { %v314_v58 = vmax.bf16 %v2106_v29, %v313_v57  ;;  %v1852_v57 = vld [vmem:[#allocation11 + $0x1cc] ss:$16 sps:$4 sm:$0xff]  }
 0x144   :  { %1725 = vmatmul.mubr.bf16.vlgmr.msra.gmra.mxu1 %v314_v58  ;;  %v1850_v58 = vld [vmem:[#allocation11 + $0x1c8] ss:$16 sps:$4 sm:$0xff]  }
 0x145   :  { %987 = vmatpush1.bf16.msra.mxu1 %v1793_v61  ;;  %v1864_v61 = vld [vmem:[#allocation11 + $0x18c] ss:$16 sps:$4 sm:$0xff]  }
 0x146   :  { %988 = vmatprep.subr.bf16.mxu1 %v1801_v0  ;;  %v1868_v0 = vld [vmem:[#allocation11 + $0x168] ss:$16 sps:$4 sm:$0xff]  }
 0x149   :  { %989 = vmatpush1.bf16.msra.mxu1 %v1799_v1  ;;  %v1876_v1 = vld [vmem:[#allocation11 + $0x14c] ss:$16 sps:$4 sm:$0xff]  }
 0x14a   :  { %990 = vmatprep.subr.bf16.mxu1 %v1807_v2  ;;  %v1874_v2 = vld [vmem:[#allocation11 + $0x148] ss:$16 sps:$4 sm:$0xff]  }
 0x14d   :  { %991 = vmatpush1.bf16.msra.mxu1 %v1805_v3  ;;  %v1879_v3 = vld [vmem:[#allocation11 + $0x124] ss:$16 sps:$4 sm:$0xff]  }
 0x14e   :  { %992 = vmatprep.subr.bf16.mxu1 %v1813_v4  ;;  %v1882_v4 = vld [vmem:[#allocation11 + $0x12c] ss:$16 sps:$4 sm:$0xff]  }
 0x151   :  { %993 = vmatpush1.bf16.msra.mxu1 %v1811_v5  ;;  %v1877_v5 = vld [vmem:[#allocation11 + $0x120] ss:$16 sps:$4 sm:$0xff]  }
 0x152   :  { %994 = vmatprep.subr.bf16.mxu1 %v1819_v6  ;;  %v1880_v6 = vld [vmem:[#allocation11 + $0x128] ss:$16 sps:$4 sm:$0xff]  }
 0x155   :  { %995 = vmatpush1.bf16.msra.mxu1 %v1817_v7  ;;  %v1885_v7 = vld [vmem:[#allocation11 + $0x104] ss:$16 sps:$4 sm:$0xff]  }
 0x156   :  { %996 = vmatprep.subr.bf16.mxu1 %v1825_v8  ;;  %v1888_v8 = vld [vmem:[#allocation11 + $0x10c] ss:$16 sps:$4 sm:$0xff]  }
 0x159   :  { %997 = vmatpush1.bf16.msra.mxu1 %v1823_v9  ;;  %v1883_v9 = vld [vmem:[#allocation11 + $0x100] ss:$16 sps:$4 sm:$0xff]  }
 0x15a   :  { %998 = vmatprep.subr.bf16.mxu1 %v1831_v10  ;;  %v1886_v10 = vld [vmem:[#allocation11 + $0x108] ss:$16 sps:$4 sm:$0xff]  }
 0x15d   :  { %999 = vmatpush1.bf16.msra.mxu1 %v1829_v11  ;;  %v1889_v11 = vld [vmem:[#allocation13 + $0x78] sm:$0xff]  }
 0x15e   :  { %1000 = vmatprep.subr.bf16.mxu1 %v1837_v12  ;;  %v1890_v12 = vld [vmem:[#allocation13 + $0xf8] sm:$0xff]  }
 0x161   :  { %1001 = vmatpush1.bf16.msra.mxu1 %v1835_v13  ;;  %v570_v13 = vld [vmem:[%s2259_s6] sm:$0x3] }
 0x162   :  { %1002 = vmatprep.subr.bf16.mxu1 %v1843_v14  ;;  %v578_v14 = vsub.s32 1, %v2211_v47 }
 0x165   :  { %1003 = vmatpush2.bf16.msra.mxu1 %v1841_v15  ;;  %v575_v15 = vrot.slane %v570_v13, %v2214_v49 }
 0x166   :  { %1004 = vmatprep.subr.bf16.mxu1 %v1849_v16  ;;  %v579_v16 = vrot.slane %v570_v13, %v578_v14 }
 0x169   :  { %1005 = vmatpush2.bf16.msra.mxu1 %v1847_v17  ;;  %v582_v17 = vpack.c.bf16 %v575_v15, %v575_v15 }
 0x16a   :  { %1006 = vmatprep.subr.bf16.mxu1 %v1855_v18  ;;  %v583_v18 = vpack.c.bf16 %v579_v16, %v579_v16 }
 0x16d   :  { %1007 = vmatpush2.bf16.msra.mxu1 %v1853_v19  ;;  %v585_v19 = vpack.i.b16 %v582_v17, %v582_v17 }
 0x16e   :  { %1008 = vmatprep.subr.bf16.mxu1 %v1861_v20  ;;  %v592_v20 = vpack.i.b16 %v583_v18, %v583_v18 }
 0x171   :  { %1009 = vmatpush2.bf16.msra.mxu1 %v1859_v21 }
 0x172   :  { %1010 = vmatprep.subr.bf16.mxu1 %v1867_v22  ;;  %v590_v22 = vrot.slane %v585_v19, %v2214_v49 }
 0x175   :  { %1011 = vmatpush2.bf16.msra.mxu1 %v1865_v23 }
 0x176   :  { %1012 = vmatprep.subr.bf16.mxu1 %v1873_v24  ;;  %v597_v24 = vrot.slane %v592_v20, %v2214_v49 }
 0x179   :  { %1013 = vmatpush2.bf16.msra.mxu1 %v1871_v25 }
 0x17a   :  { %1014 = vmatprep.subr.bf16.mxu1 %v1879_v3  ;;  %v1072_v3 = vld [vmem:[%s2261_s8] sm:$0xf] }
 0x17d   :  { %1015 = vmatpush2.bf16.msra.mxu1 %v1877_v5  ;;  %v1077_v5 = vrot.slane %v1072_v3, %v2214_v49 }
 0x17e   :  { %1016 = vmatprep.subr.bf16.mxu1 %v1885_v7  ;;  %v1081_v7 = vrot.slane %v1072_v3, %v578_v14 }
 0x181   :  { %1017 = vmatpush2.bf16.msra.mxu1 %v1883_v9  ;;  %v1094_v9 = vpack.c.bf16 %v1077_v5, %v1077_v5 }
 0x182   :  { %1664 = vmatprep.subr.bf16.mxu1 %v1889_v11  ;;  %v1095_v11 = vpack.c.bf16 %v1081_v7, %v1081_v7 }
 0x183   :  { %v1099_v13 = vpack.i.b16 %v1094_v9, %v1094_v9 }
 0x184   :  { %v1106_v16 = vpack.i.b16 %v1095_v11, %v1095_v11 }
 0x185   :  { %v1104_v19 = vrot.slane %v1099_v13, %v2214_v49 }
 0x204   :  { %v413_v31 = vpop.f32.mrf.mxu1 }
 0x205   :  { %v419_v32 = vpack.c.bf16 %v413_v31, %v413_v31 }
 0x206   :  { %v1726_v33 = vpop.f32.mrf.mxu1 }
 0x207   :  { %v429_v34 = vadd.bf16 %v428_v30, %v419_v32  ;;  %v1891_v33 = vld [vmem:[#allocation13 + $0x38] sm:$0xff]  }
 0x208   :  { %v416_v35 = vpop.f32.mrf.mxu1 }
 0x209   :  { %v430_v37 = vmax.bf16 %v2106_v29, %v429_v34  ;;  %v1892_v34 = vld [vmem:[#allocation13 + $0xb8] sm:$0xff]  }
 0x20a   :  { %v1727_v39 = vpop.f32.mrf.mxu1 }
 0x20b   :  { %560 = vmatmul.mubr.bf16.vlgmr.msra.gmra.mxu0 %v430_v37  ;;  %v1894_v37 = vld [vmem:[#allocation13 + $0xf0] sm:$0xff]  }
 0x20c   :  { %1028 = vmatpush1.bf16.msra.mxu0 %v1796_v36  ;;  %v1893_v36 = vld [vmem:[#allocation13 + $0x70] sm:$0xff]  }
 0x20d   :  { %1029 = vmatprep.subr.bf16.mxu0 %v1804_v38  ;;  %v1895_v38 = vld [vmem:[#allocation13 + $0x30] sm:$0xff]  }
 0x20e   :  { %v1896_v39 = vld [vmem:[#allocation13 + $0xb0] sm:$0xff]  }
 0x210   :  { %1030 = vmatpush1.bf16.msra.mxu0 %v1802_v40  ;;  %v1897_v40 = vld [vmem:[#allocation13 + $0x68] sm:$0xff]  }
 0x211   :  { %1031 = vmatprep.subr.bf16.mxu0 %v1810_v41  ;;  %v1898_v41 = vld [vmem:[#allocation13 + $0xe8] sm:$0xff]  }
 0x214   :  { %1032 = vmatpush1.bf16.msra.mxu0 %v1808_v42  ;;  %v1899_v42 = vld [vmem:[#allocation13 + $0x28] sm:$0xff]  }
 0x215   :  { %1033 = vmatprep.subr.bf16.mxu0 %v1816_v43  ;;  %v1900_v43 = vld [vmem:[#allocation13 + $0xa8] sm:$0xff]  }
 0x218   :  { %1034 = vmatpush1.bf16.msra.mxu0 %v1814_v44  ;;  %v1901_v44 = vld [vmem:[#allocation13 + $0x60] sm:$0xff]  }
 0x219   :  { %1035 = vmatprep.subr.bf16.mxu0 %v1822_v45  ;;  %v1902_v45 = vld [vmem:[#allocation13 + $0xe0] sm:$0xff]  }
 0x21c   :  { %1036 = vmatpush1.bf16.msra.mxu0 %v1820_v46  ;;  %v1903_v46 = vld [vmem:[#allocation13 + $0x20] sm:$0xff]  }
 0x21d   :  { %1037 = vmatprep.subr.bf16.mxu0 %v1828_v48  ;;  %v1904_v48 = vld [vmem:[#allocation13 + $0xa0] sm:$0xff]  }
 0x220   :  { %1038 = vmatpush1.bf16.msra.mxu0 %v1826_v50  ;;  %v1905_v50 = vld [vmem:[#allocation13 + $0x58] sm:$0xff]  }
 0x221   :  { %1039 = vmatprep.subr.bf16.mxu0 %v1834_v51  ;;  %v1906_v51 = vld [vmem:[#allocation13 + $0xd8] sm:$0xff]  }
 0x224   :  { %1040 = vmatpush1.bf16.msra.mxu0 %v1832_v52  ;;  %v1907_v52 = vld [vmem:[#allocation13 + $0x18] sm:$0xff]  }
 0x225   :  { %1041 = vmatprep.subr.bf16.mxu0 %v1840_v53  ;;  %v1908_v53 = vld [vmem:[#allocation13 + $0x98] sm:$0xff]  }
 0x228   :  { %1042 = vmatpush1.bf16.msra.mxu0 %v1838_v54  ;;  %v1909_v54 = vld [vmem:[#allocation13 + $0x50] sm:$0xff]  }
 0x229   :  { %1043 = vmatprep.subr.bf16.mxu0 %v1846_v55  ;;  %v1910_v55 = vld [vmem:[#allocation13 + $0xd0] sm:$0xff]  }
 0x22c   :  { %1044 = vmatpush2.bf16.msra.mxu0 %v1844_v56  ;;  %v1911_v56 = vld [vmem:[#allocation13 + $0x10] sm:$0xff]  }
 0x22d   :  { %1045 = vmatprep.subr.bf16.mxu0 %v1852_v57  ;;  %v1912_v57 = vld [vmem:[#allocation13 + $0x90] sm:$0xff]  }
 0x230   :  { %1046 = vmatpush2.bf16.msra.mxu0 %v1850_v58  ;;  %v1913_v58 = vld [vmem:[#allocation13 + $0x48] sm:$0xff]  }
 0x231   :  { %1047 = vmatprep.subr.bf16.mxu0 %v1858_v59  ;;  %v1914_v59 = vld [vmem:[#allocation13 + $0xc8] sm:$0xff]  }
 0x234   :  { %1048 = vmatpush2.bf16.msra.mxu0 %v1856_v60  ;;  %v1915_v60 = vld [vmem:[#allocation13 + $0x8] sm:$0xff]  }
 0x235   :  { %1049 = vmatprep.subr.bf16.mxu0 %v1864_v61  ;;  %v1916_v61 = vld [vmem:[#allocation13 + $0x88] sm:$0xff]  }
 0x238   :  { %1050 = vmatpush2.bf16.msra.mxu0 %v1862_v62  ;;  %v1917_v62 = vld [vmem:[#allocation13 + $0x40] sm:$0xff]  }
 0x239   :  { %1051 = vmatprep.subr.bf16.mxu0 %v1870_v63  ;;  %v1918_v63 = vld [vmem:[#allocation13 + $0xc0] sm:$0xff]  }
 0x23c   :  { %1052 = vmatpush2.bf16.msra.mxu0 %v1868_v0  ;;  %v1919_v0 = vld [vmem:[#allocation13] sm:$0xff]  }
 0x23d   :  { %1053 = vmatprep.subr.bf16.mxu0 %v1876_v1  ;;  %v1920_v1 = vld [vmem:[#allocation13 + $0x80] sm:$0xff]  }
 0x240   :  { %1054 = vmatpush2.bf16.msra.mxu0 %v1874_v2  ;;  %v1084_v2 = vsub.s32 2, %v2211_v47 }
 0x241   :  { %1055 = vmatprep.subr.bf16.mxu0 %v1882_v4  ;;  %v1088_v4 = vsub.s32 3, %v2211_v47  ;;  %v1111_v47 = vrot.slane %v1106_v16, %v2214_v49 }
 0x244   :  { %1056 = vmatpush2.bf16.msra.mxu0 %v1880_v6  ;;  %v1085_v6 = vrot.slane %v1072_v3, %v1084_v2 }
 0x245   :  { %1057 = vmatprep.subr.bf16.mxu0 %v1888_v8  ;;  %v1089_v8 = vrot.slane %v1072_v3, %v1088_v4 }
 0x248   :  { %1058 = vmatpush2.bf16.msra.mxu0 %v1886_v10  ;;  %v1096_v10 = vpack.c.bf16 %v1085_v6, %v1085_v6 }
 0x249   :  { %1686 = vmatprep.subr.bf16.mxu0 %v1890_v12  ;;  %v1097_v12 = vpack.c.bf16 %v1089_v8, %v1089_v8 }
 0x24a   :  { %v1113_v15 = vpack.i.b16 %v1096_v10, %v1096_v10 }
 0x24b   :  { %v1120_v17 = vpack.i.b16 %v1097_v12, %v1097_v12 }
 0x24d   :  { %v1125_v14 = vrot.slane %v1120_v17, %v2214_v49 }
 0x2cb   :  { %v561_v21 = vpop.f32.mrf.mxu0 }
 0x2cc   :  { %v568_v23 = vpack.c.bf16 %v561_v21, %v561_v21  ;;  %v1118_v21 = vrot.slane %v1113_v15, %v2214_v49 }
 0x2cd   :  { %v563_v25 = vpop.f32.mrf.mxu0 }
 0x2ce   :  { %v569_v26 = vpack.c.bf16 %v563_v25, %v563_v25  ;;  %v598_v27 = vadd.bf16 %v590_v22, %v568_v23 }
 0x2cf   :  { %v565_v28 = vpop.f32.mrf.mxu0 }
 0x2d0   :  { %v599_v30 = vadd.bf16 %v597_v24, %v569_v26  ;;  %v600_v35 = vmax.bf16 %v2106_v29, %v598_v27 }
 0x2d1   :  { %v566_v31 = vpop.f32.mrf.mxu0 }
 0x2d2   :  { %v601_v32 = vmax.bf16 %v2106_v29, %v599_v30 }
 0x2d4   :  { %1018 = vmatprep.mubr.bf16.mxu1 %v601_v32  ;;  %1059 = vmatprep.mubr.bf16.mxu0 %v601_v32 }
 0x2d5   :  { %1019 = vmatmul.mubr.bf16.vlgmr.msra.gmra.mxu1 %v600_v35  ;;  %1060 = vmatmul.mubr.bf16.vlgmr.msra.gmra.mxu0 %v600_v35 }
 0x2d6   :  { %1665 = vmatpush3.bf16.msra.mxu1 %v1891_v33  ;;  %1687 = vmatpush3.bf16.msra.mxu0 %v1892_v34 }
 0x2d7   :  { %1666 = vmatprep.subr.bf16.mxu1 %v1893_v36  ;;  %1688 = vmatprep.subr.bf16.mxu0 %v1894_v37 }
 0x2da   :  { %1667 = vmatpush3.bf16.msra.mxu1 %v1895_v38  ;;  %1689 = vmatpush3.bf16.msra.mxu0 %v1896_v39 }
 0x2db   :  { %1668 = vmatprep.subr.bf16.mxu1 %v1897_v40  ;;  %1690 = vmatprep.subr.bf16.mxu0 %v1898_v41 }
 0x2de   :  { %1669 = vmatpush3.bf16.msra.mxu1 %v1899_v42  ;;  %1691 = vmatpush3.bf16.msra.mxu0 %v1900_v43  ;;  %v1600_v42 = vld [vmem:[%s2263_s10] ss:$0 sm:$0xff] }
 0x2df   :  { %1670 = vmatprep.subr.bf16.mxu1 %v1901_v44  ;;  %1692 = vmatprep.subr.bf16.mxu0 %v1902_v45 }
 0x2e2   :  { %1671 = vmatpush3.bf16.msra.mxu1 %v1903_v46  ;;  %1693 = vmatpush3.bf16.msra.mxu0 %v1904_v48 }
 0x2e3   :  { %1672 = vmatprep.subr.bf16.mxu1 %v1905_v50  ;;  %1694 = vmatprep.subr.bf16.mxu0 %v1906_v51 }
 0x2e6   :  { %1673 = vmatpush3.bf16.msra.mxu1 %v1907_v52  ;;  %1695 = vmatpush3.bf16.msra.mxu0 %v1908_v53 }
 0x2e7   :  { %1674 = vmatprep.subr.bf16.mxu1 %v1909_v54  ;;  %1696 = vmatprep.subr.bf16.mxu0 %v1910_v55 }
 0x2ea   :  { %1675 = vmatpush3.bf16.msra.mxu1 %v1911_v56  ;;  %1697 = vmatpush3.bf16.msra.mxu0 %v1912_v57 }
 0x2eb   :  { %1676 = vmatprep.subr.bf16.mxu1 %v1913_v58  ;;  %1698 = vmatprep.subr.bf16.mxu0 %v1914_v59 }
 0x2ee   :  { %1677 = vmatpush3.bf16.msra.mxu1 %v1915_v60  ;;  %1699 = vmatpush3.bf16.msra.mxu0 %v1916_v61 }
 0x2ef   :  { %1678 = vmatprep.subr.bf16.mxu1 %v1917_v62  ;;  %1700 = vmatprep.subr.bf16.mxu0 %v1918_v63 }
 0x2f2   :  { %1679 = vmatpush3.bf16.msra.mxu1 %v1919_v0  ;;  %1701 = vmatpush3.bf16.msra.mxu0 %v1920_v1 }
 0x395   :  { %v1020_v18 = vpop.f32.mrf.mxu1  ;;  %v1061_v20 = vpop.f32.mrf.mxu0 }
 0x396   :  { %v1068_v22 = vpack.c.bf16 %v1020_v18, %v1020_v18  ;;  %v1070_v23 = vpack.c.bf16 %v1061_v20, %v1061_v20 }
 0x397   :  { %v1022_v24 = vpop.f32.mrf.mxu1  ;;  %v1063_v25 = vpop.f32.mrf.mxu0 }
 0x398   :  { %v1069_v26 = vpack.c.bf16 %v1022_v24, %v1022_v24  ;;  %v1071_v27 = vpack.c.bf16 %v1063_v25, %v1063_v25  ;;  %v1126_v28 = vadd.bf16 %v1104_v19, %v1068_v22  ;;  %v1128_v30 = vadd.bf16 %v1118_v21, %v1070_v23 }
 0x399   :  { %v1024_v31 = vpop.f32.mrf.mxu1  ;;  %v1065_v32 = vpop.f32.mrf.mxu0 }
 0x39a   :  { %v1127_v33 = vadd.bf16 %v1111_v47, %v1069_v26  ;;  %v1129_v34 = vadd.bf16 %v1125_v14, %v1071_v27  ;;  %v1130_v39 = vmax.bf16 %v2106_v29, %v1126_v28  ;;  %v1132_v49 = vmax.bf16 %v2106_v29, %v1128_v30 }
 0x39b   :  { %v1025_v35 = vpop.f32.mrf.mxu1  ;;  %v1066_v36 = vpop.f32.mrf.mxu0 }
 0x39c   :  { %v1131_v37 = vmax.bf16 %v2106_v29, %v1127_v33  ;;  %v1133_v38 = vmax.bf16 %v2106_v29, %v1129_v34 }
 0x39e   :  { %1429 = vmatprep.mubr.bf16.mxu1 %v1131_v37  ;;  %1469 = vmatprep.mubr.bf16.mxu0 %v1133_v38 }
 0x39f   :  { %1430 = vmatmul.mubr.bf16.vlgmr.msra.gmra.mxu1 %v1130_v39  ;;  %1470 = vmatmul.mubr.bf16.vlgmr.msra.gmra.mxu0 %v1132_v49 }
 0x45f   :  { %v1680_v40 = vpop.f32.mrf.mxu1  ;;  %v1702_v41 = vpop.f32.mrf.mxu0 }
 0x461   :  { %v1681_v43 = vpop.f32.mrf.mxu1  ;;  %v1703_v44 = vpop.f32.mrf.mxu0 }
 0x462   :  { %v1682_v45 = vadd.f32 %v1681_v43, %v1680_v40  ;;  %v1704_v51 = vadd.f32 %v1703_v44, %v1702_v41 }
 0x463   :  { %v1683_v46 = vpop.f32.mrf.mxu1  ;;  %v1705_v48 = vpop.f32.mrf.mxu0 }
 0x464   :  { %v1432_v50 = vadd.f32 %v1682_v45, %v1600_v42 }
 0x465   :  { %v1684_v29 = vpop.f32.mrf.mxu1  ;;  %v1706_v52 = vpop.f32.mrf.mxu0 }
 0x466   :  { %v1472_v53 = vadd.f32 %v1704_v51, %v1432_v50 }
 0x468   :  { %1477 = vst [vmem:[#allocation14] sm:$0xff] %v1472_v53 }
 0x469   :  { %2072 = shalt.err (!%p2069_p11)
}
 0x46a   :  { %1487 = dma.vmem_to_hbm [thread:$0]  %s1485_s19, 128, %s2264_s11, [#allocation4]  }
 0x46b   :  { %2089 = dma.done.wait [#allocation4], 128  }
 0x46c   :  { %2090 = vsyncadd [#allocation4], 4294967168 }
 0x46d   :  { %1491 = vsyncpa [#allocation3], 1 }
 0x46e   :  { %1492 = vsyncpa [#allocation6], 1 }
 0x46f   :  { %1493 = vsyncpa [#allocation9], 1 }
 0x470   :  { %1494 = vsyncpa [#allocation12], 1 }
 0x471   :  { %1495 = vsyncpa [#allocation4], 1 }

</bundles_post_ra>
